<compile_context>
chip_gen: v7x
topology: tpu7x:2x2x1
jax: 0.10.0
libtpu: 0.0.40
codegen_flags: <defaults>
</compile_context>

<pallas_src>
import math
import functools

import jax
import jax.numpy as jnp
from jax import lax
from jax.experimental import pallas as pl
from jax.experimental.pallas import tpu as pltpu


def _mha_fused_kernel(x_ref, wqkvt_ref, wot_ref, o_ref, *, num_head, d_k, num_feature):
    """Single-invocation fused MHA.

    x_ref     : (S, F)    bf16 input (batch of 1 squeezed in the wrapper)
    wqkvt_ref : (F, 3F)   bf16  [Wq^T | Wk^T | Wv^T]  (so [Q|K|V] = x @ wqkvt)
    wot_ref   : (F, F)    bf16  Wo^T                  (so out = y @ wot)
    o_ref     : (S, F)    f32 output
    """
    F = num_feature
    x = x_ref[...]                                                    # (S, F) bf16
    scale = 1.0 / math.sqrt(d_k)

    # Fused Q/K/V projection: one MXU matmul, f32 accumulation.
    qkv = jnp.dot(x, wqkvt_ref[...], preferred_element_type=jnp.float32)   # (S, 3F) f32
    q = qkv[:, :F] * scale                                            # fold 1/sqrt(d_k) once
    k = qkv[:, F:2 * F]
    v = qkv[:, 2 * F:]

    # Per-head attention, unrolled at trace time (H is small); static lane slices.
    ys = []
    for h in range(num_head):
        sl = slice(h * d_k, (h + 1) * d_k)
        q_h = q[:, sl].astype(jnp.bfloat16)                           # (S, d_k)
        k_h = k[:, sl].astype(jnp.bfloat16)                           # (S, d_k)
        v_h = v[:, sl].astype(jnp.bfloat16)                           # (S, d_k)

        # scores = q_h @ k_h^T without an explicit transpose: contract the d_k axes.
        s = lax.dot_general(q_h, k_h, (((1,), (1,)), ((), ())),
                            preferred_element_type=jnp.float32)       # (S, S) f32

        # Numerically-stable softmax in f32 (attn dropout is identity in eval mode).
        s = s - jnp.max(s, axis=-1, keepdims=True)
        p = jnp.exp(s)
        inv_l = pl.reciprocal(jnp.sum(p, axis=-1, keepdims=True), approx=True)
        attn = p * inv_l

        ys.append(jnp.dot(attn.astype(jnp.bfloat16), v_h,
                          preferred_element_type=jnp.float32))        # (S, d_k)

    # Concat heads back to (S, F) and do ONE output projection (fc dropout = identity).
    y = jnp.concatenate(ys, axis=-1).astype(jnp.bfloat16)             # (S, F)
    o_ref[...] = jnp.dot(y, wot_ref[...], preferred_element_type=jnp.float32)


def attention_extractor_forward(x, wq, wk, wv, wo, *, num_head):
    """x: (1, S, F) float32; wq/wk/wv/wo: (F, F) nn.Linear weights in (out, in) layout."""
    _, S, F = x.shape
    d_k = F // num_head

    # Wrapper-side layout plumbing (tiny, fused by XLA): squeeze batch, pre-transpose
    # weights, concatenate QKV weights, cast MXU operands to bf16 (halves DMA bytes;
    # accumulation stays f32 in-kernel).
    x2d = x.reshape(S, F).astype(jnp.bfloat16)
    wqkvt = jnp.concatenate([wq.T, wk.T, wv.T], axis=1).astype(jnp.bfloat16)   # (F, 3F)
    wot = wo.T.astype(jnp.bfloat16)                                            # (F, F)

    kernel = functools.partial(_mha_fused_kernel, num_head=num_head, d_k=d_k,
                               num_feature=F)

    out2d = pl.pallas_call(
        kernel,
        out_shape=jax.ShapeDtypeStruct((S, F), jnp.float32),
        grid=(1,),  # single step: all per-head work fused into one invocation
        in_specs=[
            pl.BlockSpec((S, F), lambda i: (0, 0)),        # x
            pl.BlockSpec((F, 3 * F), lambda i: (0, 0)),    # [Wq|Wk|Wv]^T fused
            pl.BlockSpec((F, F), lambda i: (0, 0)),        # Wo^T
        ],
        out_specs=pl.BlockSpec((S, F), lambda i: (0, 0)),
        compiler_params=pltpu.CompilerParams(
            dimension_semantics=("arbitrary",),
        ),
    )(x2d, wqkvt, wot)

    return out2d.reshape(1, S, F).astype(jnp.float32)


def _reference_forward(x, wq, wk, wv, wo, *, num_head):
    """Pure-JAX f32 reference mirroring the PyTorch module (eval mode)."""
    _, S, F = x.shape
    d_k = F // num_head
    xf = x.reshape(S, F)
    Q = xf @ wq.T
    K = xf @ wk.T
    V = xf @ wv.T
    Q = Q.reshape(S, num_head, d_k).transpose(1, 0, 2)
    K = K.reshape(S, num_head, d_k).transpose(1, 0, 2)
    V = V.reshape(S, num_head, d_k).transpose(1, 0, 2)
    attn = jnp.einsum("hqd,hkd->hqk", Q, K) / math.sqrt(d_k)
    attn = jax.nn.softmax(attn, axis=-1)
    y = jnp.einsum("hqk,hkd->hqd", attn, V)          # (H, S, d_k)
    y = y.transpose(1, 0, 2).reshape(S, F)           # (S, F)
    out = y @ wo.T
    return out.reshape(1, S, F)


if __name__ == "__main__":
    # Small shapes consistent with the module: batch=1 (module hard-codes it),
    # seq=8, num_feature=32, num_head=4 -> d_k=8.
    S, F, H = 8, 32, 4

    key = jax.random.PRNGKey(0)
    kx, kq, kk, kv, ko = jax.random.split(key, 5)

    x = jax.random.normal(kx, (1, S, F), dtype=jnp.float32)
    scale = 1.0 / math.sqrt(F)
    wq = jax.random.uniform(kq, (F, F), jnp.float32, -scale, scale)
    wk = jax.random.uniform(kk, (F, F), jnp.float32, -scale, scale)
    wv = jax.random.uniform(kv, (F, F), jnp.float32, -scale, scale)
    wo = jax.random.uniform(ko, (F, F), jnp.float32, -scale, scale)

    out = attention_extractor_forward(x, wq, wk, wv, wo, num_head=H)
    out = jax.block_until_ready(out)

    ref = _reference_forward(x, wq, wk, wv, wo, num_head=H)
    assert out.shape == (1, S, F)
    # Tolerance loosened vs a pure-f32 version: bf16 MXU operands + approx reciprocal.
    assert jnp.allclose(out, ref, atol=5e-2, rtol=5e-2), "mismatch vs reference"

    print("KERNEL_OK")
</pallas_src>

<mosaic_0001>
module attributes {stable_mosaic.version = 11 : i64} {
  func.func @_mha_fused_kernel(%arg0: i32, %arg1: memref<8x32xbf16, #tpu.memory_space<vmem>>, %arg2: memref<32x96xbf16, #tpu.memory_space<vmem>>, %arg3: memref<32x32xbf16, #tpu.memory_space<vmem>>, %arg4: memref<8x32xf32, #tpu.memory_space<vmem>>) attributes {dimension_semantics = [#tpu.dimension_semantics<arbitrary>], iteration_bounds = array<i64: 1>, scalar_prefetch = 0 : i64, scratch_operands = 0 : i64, tpu.core_type = #tpu.core_type<tc>, window_params = [{pipeline_mode = #tpu.pipeline_mode<synchronous>, transform_indices = @transform_0, window_bounds = array<i64: 8, 32>}, {pipeline_mode = #tpu.pipeline_mode<synchronous>, transform_indices = @transform_1, window_bounds = array<i64: 32, 96>}, {pipeline_mode = #tpu.pipeline_mode<synchronous>, transform_indices = @transform_2, window_bounds = array<i64: 32, 32>}, {pipeline_mode = #tpu.pipeline_mode<synchronous>, transform_indices = @transform_3, window_bounds = array<i64: 8, 32>}]} {
    %c0 = arith.constant 0 : index
    %c0_0 = arith.constant 0 : index
    %0 = vector.load %arg1[%c0, %c0_0] : memref<8x32xbf16, #tpu.memory_space<vmem>>, vector<8x32xbf16>
    %c0_1 = arith.constant 0 : index
    %c0_2 = arith.constant 0 : index
    %1 = vector.load %arg2[%c0_1, %c0_2] : memref<32x96xbf16, #tpu.memory_space<vmem>>, vector<32x96xbf16>
    %cst = arith.constant dense<0.000000e+00> : vector<8x96xf32>
    %2 = tpu.matmul %0, %1, %cst {dimension_numbers = #tpu.dot_dimension_numbers<[1], [0], [0], [1], [0, 0, 1, 1], [], []>} : vector<8x32xbf16>, vector<32x96xbf16>, vector<8x96xf32> -> vector<8x96xf32>
    %3 = vector.extract_strided_slice %2 {offsets = [0, 0], sizes = [8, 32], strides = [1, 1]} : vector<8x96xf32> to vector<8x32xf32>
    %cst_3 = arith.constant 0.353553385 : f32
    %4 = vector.broadcast %cst_3 : f32 to vector<8x32xf32>
    %5 = arith.mulf %3, %4 : vector<8x32xf32>
    %6 = vector.extract_strided_slice %2 {offsets = [0, 32], sizes = [8, 32], strides = [1, 1]} : vector<8x96xf32> to vector<8x32xf32>
    %7 = vector.extract_strided_slice %2 {offsets = [0, 64], sizes = [8, 32], strides = [1, 1]} : vector<8x96xf32> to vector<8x32xf32>
    %8 = vector.extract_strided_slice %5 {offsets = [0, 0], sizes = [8, 8], strides = [1, 1]} : vector<8x32xf32> to vector<8x8xf32>
    %9 = arith.truncf %8 : vector<8x8xf32> to vector<8x8xbf16>
    %10 = vector.extract_strided_slice %6 {offsets = [0, 0], sizes = [8, 8], strides = [1, 1]} : vector<8x32xf32> to vector<8x8xf32>
    %11 = arith.truncf %10 : vector<8x8xf32> to vector<8x8xbf16>
    %12 = vector.extract_strided_slice %7 {offsets = [0, 0], sizes = [8, 8], strides = [1, 1]} : vector<8x32xf32> to vector<8x8xf32>
    %13 = arith.truncf %12 : vector<8x8xf32> to vector<8x8xbf16>
    %cst_4 = arith.constant dense<0.000000e+00> : vector<8x8xf32>
    %14 = tpu.matmul %9, %11, %cst_4 {dimension_numbers = #tpu.dot_dimension_numbers<[1], [1], [0], [0], [0, 0, 1, 0], [], []>} : vector<8x8xbf16>, vector<8x8xbf16>, vector<8x8xf32> -> vector<8x8xf32>
    %cst_5 = arith.constant dense<0xFF800000> : vector<8xf32>
    %15 = vector.multi_reduction <maximumf>, %14, %cst_5 [1] : vector<8x8xf32> to vector<8xf32>
    %16 = vector.shape_cast %15 : vector<8xf32> to vector<8x1xf32>
    %17 = vector.broadcast %16 : vector<8x1xf32> to vector<8x8xf32>
    %18 = arith.subf %14, %17 : vector<8x8xf32>
    %19 = math.exp %18 : vector<8x8xf32>
    %cst_6 = arith.constant dense<0.000000e+00> : vector<8xf32>
    %20 = vector.multi_reduction <add>, %19, %cst_6 [1] : vector<8x8xf32> to vector<8xf32>
    %21 = vector.shape_cast %20 : vector<8xf32> to vector<8x1xf32>
    %22 = tpu.reciprocal %21 {approx = true} : vector<8x1xf32> -> vector<8x1xf32>
    %23 = vector.broadcast %22 : vector<8x1xf32> to vector<8x8xf32>
    %24 = arith.mulf %19, %23 : vector<8x8xf32>
    %25 = arith.truncf %24 : vector<8x8xf32> to vector<8x8xbf16>
    %cst_7 = arith.constant dense<0.000000e+00> : vector<8x8xf32>
    %26 = tpu.matmul %25, %13, %cst_7 {dimension_numbers = #tpu.dot_dimension_numbers<[1], [0], [0], [1], [0, 0, 1, 1], [], []>} : vector<8x8xbf16>, vector<8x8xbf16>, vector<8x8xf32> -> vector<8x8xf32>
    %27 = vector.extract_strided_slice %5 {offsets = [0, 8], sizes = [8, 8], strides = [1, 1]} : vector<8x32xf32> to vector<8x8xf32>
    %28 = arith.truncf %27 : vector<8x8xf32> to vector<8x8xbf16>
    %29 = vector.extract_strided_slice %6 {offsets = [0, 8], sizes = [8, 8], strides = [1, 1]} : vector<8x32xf32> to vector<8x8xf32>
    %30 = arith.truncf %29 : vector<8x8xf32> to vector<8x8xbf16>
    %31 = vector.extract_strided_slice %7 {offsets = [0, 8], sizes = [8, 8], strides = [1, 1]} : vector<8x32xf32> to vector<8x8xf32>
    %32 = arith.truncf %31 : vector<8x8xf32> to vector<8x8xbf16>
    %cst_8 = arith.constant dense<0.000000e+00> : vector<8x8xf32>
    %33 = tpu.matmul %28, %30, %cst_8 {dimension_numbers = #tpu.dot_dimension_numbers<[1], [1], [0], [0], [0, 0, 1, 0], [], []>} : vector<8x8xbf16>, vector<8x8xbf16>, vector<8x8xf32> -> vector<8x8xf32>
    %cst_9 = arith.constant dense<0xFF800000> : vector<8xf32>
    %34 = vector.multi_reduction <maximumf>, %33, %cst_9 [1] : vector<8x8xf32> to vector<8xf32>
    %35 = vector.shape_cast %34 : vector<8xf32> to vector<8x1xf32>
    %36 = vector.broadcast %35 : vector<8x1xf32> to vector<8x8xf32>
    %37 = arith.subf %33, %36 : vector<8x8xf32>
    %38 = math.exp %37 : vector<8x8xf32>
    %cst_10 = arith.constant dense<0.000000e+00> : vector<8xf32>
    %39 = vector.multi_reduction <add>, %38, %cst_10 [1] : vector<8x8xf32> to vector<8xf32>
    %40 = vector.shape_cast %39 : vector<8xf32> to vector<8x1xf32>
    %41 = tpu.reciprocal %40 {approx = true} : vector<8x1xf32> -> vector<8x1xf32>
    %42 = vector.broadcast %41 : vector<8x1xf32> to vector<8x8xf32>
    %43 = arith.mulf %38, %42 : vector<8x8xf32>
    %44 = arith.truncf %43 : vector<8x8xf32> to vector<8x8xbf16>
    %cst_11 = arith.constant dense<0.000000e+00> : vector<8x8xf32>
    %45 = tpu.matmul %44, %32, %cst_11 {dimension_numbers = #tpu.dot_dimension_numbers<[1], [0], [0], [1], [0, 0, 1, 1], [], []>} : vector<8x8xbf16>, vector<8x8xbf16>, vector<8x8xf32> -> vector<8x8xf32>
    %46 = vector.extract_strided_slice %5 {offsets = [0, 16], sizes = [8, 8], strides = [1, 1]} : vector<8x32xf32> to vector<8x8xf32>
    %47 = arith.truncf %46 : vector<8x8xf32> to vector<8x8xbf16>
    %48 = vector.extract_strided_slice %6 {offsets = [0, 16], sizes = [8, 8], strides = [1, 1]} : vector<8x32xf32> to vector<8x8xf32>
    %49 = arith.truncf %48 : vector<8x8xf32> to vector<8x8xbf16>
    %50 = vector.extract_strided_slice %7 {offsets = [0, 16], sizes = [8, 8], strides = [1, 1]} : vector<8x32xf32> to vector<8x8xf32>
    %51 = arith.truncf %50 : vector<8x8xf32> to vector<8x8xbf16>
    %cst_12 = arith.constant dense<0.000000e+00> : vector<8x8xf32>
    %52 = tpu.matmul %47, %49, %cst_12 {dimension_numbers = #tpu.dot_dimension_numbers<[1], [1], [0], [0], [0, 0, 1, 0], [], []>} : vector<8x8xbf16>, vector<8x8xbf16>, vector<8x8xf32> -> vector<8x8xf32>
    %cst_13 = arith.constant dense<0xFF800000> : vector<8xf32>
    %53 = vector.multi_reduction <maximumf>, %52, %cst_13 [1] : vector<8x8xf32> to vector<8xf32>
    %54 = vector.shape_cast %53 : vector<8xf32> to vector<8x1xf32>
    %55 = vector.broadcast %54 : vector<8x1xf32> to vector<8x8xf32>
    %56 = arith.subf %52, %55 : vector<8x8xf32>
    %57 = math.exp %56 : vector<8x8xf32>
    %cst_14 = arith.constant dense<0.000000e+00> : vector<8xf32>
    %58 = vector.multi_reduction <add>, %57, %cst_14 [1] : vector<8x8xf32> to vector<8xf32>
    %59 = vector.shape_cast %58 : vector<8xf32> to vector<8x1xf32>
    %60 = tpu.reciprocal %59 {approx = true} : vector<8x1xf32> -> vector<8x1xf32>
    %61 = vector.broadcast %60 : vector<8x1xf32> to vector<8x8xf32>
    %62 = arith.mulf %57, %61 : vector<8x8xf32>
    %63 = arith.truncf %62 : vector<8x8xf32> to vector<8x8xbf16>
    %cst_15 = arith.constant dense<0.000000e+00> : vector<8x8xf32>
    %64 = tpu.matmul %63, %51, %cst_15 {dimension_numbers = #tpu.dot_dimension_numbers<[1], [0], [0], [1], [0, 0, 1, 1], [], []>} : vector<8x8xbf16>, vector<8x8xbf16>, vector<8x8xf32> -> vector<8x8xf32>
    %65 = vector.extract_strided_slice %5 {offsets = [0, 24], sizes = [8, 8], strides = [1, 1]} : vector<8x32xf32> to vector<8x8xf32>
    %66 = arith.truncf %65 : vector<8x8xf32> to vector<8x8xbf16>
    %67 = vector.extract_strided_slice %6 {offsets = [0, 24], sizes = [8, 8], strides = [1, 1]} : vector<8x32xf32> to vector<8x8xf32>
    %68 = arith.truncf %67 : vector<8x8xf32> to vector<8x8xbf16>
    %69 = vector.extract_strided_slice %7 {offsets = [0, 24], sizes = [8, 8], strides = [1, 1]} : vector<8x32xf32> to vector<8x8xf32>
    %70 = arith.truncf %69 : vector<8x8xf32> to vector<8x8xbf16>
    %cst_16 = arith.constant dense<0.000000e+00> : vector<8x8xf32>
    %71 = tpu.matmul %66, %68, %cst_16 {dimension_numbers = #tpu.dot_dimension_numbers<[1], [1], [0], [0], [0, 0, 1, 0], [], []>} : vector<8x8xbf16>, vector<8x8xbf16>, vector<8x8xf32> -> vector<8x8xf32>
    %cst_17 = arith.constant dense<0xFF800000> : vector<8xf32>
    %72 = vector.multi_reduction <maximumf>, %71, %cst_17 [1] : vector<8x8xf32> to vector<8xf32>
    %73 = vector.shape_cast %72 : vector<8xf32> to vector<8x1xf32>
    %74 = vector.broadcast %73 : vector<8x1xf32> to vector<8x8xf32>
    %75 = arith.subf %71, %74 : vector<8x8xf32>
    %76 = math.exp %75 : vector<8x8xf32>
    %cst_18 = arith.constant dense<0.000000e+00> : vector<8xf32>
    %77 = vector.multi_reduction <add>, %76, %cst_18 [1] : vector<8x8xf32> to vector<8xf32>
    %78 = vector.shape_cast %77 : vector<8xf32> to vector<8x1xf32>
    %79 = tpu.reciprocal %78 {approx = true} : vector<8x1xf32> -> vector<8x1xf32>
    %80 = vector.broadcast %79 : vector<8x1xf32> to vector<8x8xf32>
    %81 = arith.mulf %76, %80 : vector<8x8xf32>
    %82 = arith.truncf %81 : vector<8x8xf32> to vector<8x8xbf16>
    %cst_19 = arith.constant dense<0.000000e+00> : vector<8x8xf32>
    %83 = tpu.matmul %82, %70, %cst_19 {dimension_numbers = #tpu.dot_dimension_numbers<[1], [0], [0], [1], [0, 0, 1, 1], [], []>} : vector<8x8xbf16>, vector<8x8xbf16>, vector<8x8xf32> -> vector<8x8xf32>
    %84 = tpu.concatenate %26, %45, %64, %83 in 1 : vector<8x8xf32>, vector<8x8xf32>, vector<8x8xf32>, vector<8x8xf32> -> vector<8x32xf32>
    %85 = arith.truncf %84 : vector<8x32xf32> to vector<8x32xbf16>
    %c0_20 = arith.constant 0 : index
    %c0_21 = arith.constant 0 : index
    %86 = vector.load %arg3[%c0_20, %c0_21] : memref<32x32xbf16, #tpu.memory_space<vmem>>, vector<32x32xbf16>
    %cst_22 = arith.constant dense<0.000000e+00> : vector<8x32xf32>
    %87 = tpu.matmul %85, %86, %cst_22 {dimension_numbers = #tpu.dot_dimension_numbers<[1], [0], [0], [1], [0, 0, 1, 1], [], []>} : vector<8x32xbf16>, vector<32x32xbf16>, vector<8x32xf32> -> vector<8x32xf32>
    %c0_23 = arith.constant 0 : index
    %c0_24 = arith.constant 0 : index
    %88 = vector.load %arg4[%c0_23, %c0_24] : memref<8x32xf32, #tpu.memory_space<vmem>>, vector<8x32xf32>
    tpu.vector_store %arg4[%c0_23, %c0_24], %87 {strides = array<i32>} : memref<8x32xf32, #tpu.memory_space<vmem>>, vector<8x32xf32>,
    return
  }
  func.func @transform_0(%arg0: i32) -> (i32, i32) {
    %c0_i32 = arith.constant 0 : i32
    %c0_i32_0 = arith.constant 0 : i32
    %c0_i32_1 = arith.constant 0 : i32
    return %c0_i32, %c0_i32_0 : i32, i32
  }
  func.func @transform_1(%arg0: i32) -> (i32, i32) {
    %c0_i32 = arith.constant 0 : i32
    %c0_i32_0 = arith.constant 0 : i32
    %c0_i32_1 = arith.constant 0 : i32
    return %c0_i32, %c0_i32_0 : i32, i32
  }
  func.func @transform_2(%arg0: i32) -> (i32, i32) {
    %c0_i32 = arith.constant 0 : i32
    %c0_i32_0 = arith.constant 0 : i32
    %c0_i32_1 = arith.constant 0 : i32
    return %c0_i32, %c0_i32_0 : i32, i32
  }
  func.func @transform_3(%arg0: i32) -> (i32, i32) {
    %c0_i32 = arith.constant 0 : i32
    %c0_i32_0 = arith.constant 0 : i32
    %c0_i32_1 = arith.constant 0 : i32
    return %c0_i32, %c0_i32_0 : i32, i32
  }
}

</mosaic_0001>

<bundles_post_ra>
// kernel: tpu_custom_call.1
= control target key start
LH: loop header
LB: loop body
LE: loop exit
PB: predicated region body
PF: predicated region fallthrough
CT: control target
= control target key end

     0   :  { %8 = vsyncpa [#allocation3], 0  ;;  %s1056_s0 = inlined_call_operand.hbm [shape: bf16[8,32], index: 0, kind: input, shape index: {}]   ;;  %s1057_s1 = inlined_call_operand.hbm [shape: bf16[32,96], index: 1, kind: input, shape index: {}]   ;;  %s1058_s2 = inlined_call_operand.hbm [shape: bf16[32,32], index: 2, kind: input, shape index: {}]   ;;  %s1059_s3 = inlined_call_operand.hbm [shape: f32[8,32], index: 3, kind: output, shape index: {}]  }
   0x1   :  { %9 = vsyncpa [#allocation6], 0 }
   0x2   :  { %10 = vsyncpa [#allocation4], 0  ;;  %s890_s12 = smov [#allocation5]   ;;  %s796_s16 = scalar_lea.hbm %s1057_s1, 256 }
   0x3   :  { %s26_s13 = sshll.u32 %s890_s12, 4  ;;  %p797_p0 = scmp.ne.s32.totalorder %s1057_s1, %s796_s16  ;;  %s27_s13 = int_to_ptr.vmem [resolvable:$true] %s26_s13 }
   0x4   :  { %p800_p1 = scmp.lt.u32.totalorder %s796_s16, %s1057_s1 }
   0x6   :  { %p802_p2 = pnand %p800_p1, %p797_p0 }
   0x8   :  { %805 = shalt.err (!%p802_p2)
}
   0x9   :  { %s806_s21 = scalar_lea.vmem %s27_s13, 256  ;;  %p811_p4 = scmp.lt.s32.totalorder %s27_s13, %s27_s13 }
   0xa   :  { %p807_p3 = scmp.ne.s32.totalorder %s27_s13, %s806_s21  ;;  %p812_p5 = scmp.lt.s32.totalorder %s806_s21, %s806_s21 }
   0xc   :  { %p813_p6 = por %p812_p5, %p811_p4 }
   0xe   :  { %p814_p7 = pnand %p813_p6, %p807_p3 }
  0x10   :  { %817 = shalt.err (!%p814_p7)
}
  0x11   :  { %s891_s22 = smov 64   ;;  %s892_s23 = smov 4  }
  0x12   :  { %32 = dma.hbm_to_vmem [thread:$0]  %s1057_s1, 256, %s27_s13, [#allocation6], %s891_s22, %s891_s22, %s892_s23  }
  0x13   :  { %s893_s26 = smov [#allocation2]   ;;  %s894_s28 = smov [#allocation7]  }
  0x14   :  { %s17_s27 = sshll.u32 %s893_s26, 4  ;;  %s38_s29 = sshll.u32 %s894_s28, 4  ;;  %s18_s27 = int_to_ptr.vmem [resolvable:$true] %s17_s27  ;;  %s39_s29 = int_to_ptr.vmem [resolvable:$true] %s38_s29 }
  0x15   :  { %s818_s5 = scalar_lea.hbm %s1056_s0, 64 }
  0x16   :  { %p819_p8 = scmp.ne.s32.totalorder %s1056_s0, %s818_s5  ;;  %p822_p9 = scmp.lt.u32.totalorder %s818_s5, %s1056_s0 }
  0x18   :  { %p824_p10 = pnand %p822_p9, %p819_p8 }
  0x1a   :  { %827 = shalt.err (!%p824_p10)
}
  0x1b   :  { %s828_s1 = scalar_lea.vmem %s18_s27, 64  ;;  %p833_p12 = scmp.lt.s32.totalorder %s18_s27, %s18_s27 }
  0x1c   :  { %p829_p11 = scmp.ne.s32.totalorder %s18_s27, %s828_s1  ;;  %p834_p13 = scmp.lt.s32.totalorder %s828_s1, %s828_s1 }
  0x1e   :  { %p835_p0 = por %p834_p13, %p833_p12 }
  0x20   :  { %p836_p1 = pnand %p835_p0, %p829_p11 }
  0x22   :  { %839 = shalt.err (!%p836_p1)
}
  0x23   :  { %20 = dma.hbm_to_vmem [thread:$0]  %s1056_s0, 64, %s18_s27, [#allocation3]  }
  0x24   :  { %s840_s14 = scalar_lea.hbm %s1058_s2, 256 }
  0x25   :  { %p841_p2 = scmp.ne.s32.totalorder %s1058_s2, %s840_s14  ;;  %p844_p3 = scmp.lt.u32.totalorder %s840_s14, %s1058_s2 }
  0x27   :  { %p846_p4 = pnand %p844_p3, %p841_p2 }
  0x29   :  { %849 = shalt.err (!%p846_p4)
}
  0x2a   :  { %s850_s19 = scalar_lea.vmem %s39_s29, 256  ;;  %p855_p6 = scmp.lt.s32.totalorder %s39_s29, %s39_s29 }
  0x2b   :  { %p851_p5 = scmp.ne.s32.totalorder %s39_s29, %s850_s19  ;;  %p856_p7 = scmp.lt.s32.totalorder %s850_s19, %s850_s19 }
  0x2d   :  { %p857_p8 = por %p856_p7, %p855_p6 }
  0x2f   :  { %p858_p9 = pnand %p857_p8, %p851_p5 }
  0x31   :  { %861 = shalt.err (!%p858_p9)
}
  0x32   :  { %44 = dma.hbm_to_vmem [thread:$0]  %s1058_s2, 256, %s39_s29, [#allocation6], %s891_s22, %s891_s22, %s892_s23  }
  0x33   :  { %884 = dma.done.wait [#allocation3], 64  }
  0x34   :  { %885 = vsyncadd [#allocation3], 4294967232 }
  0x35   :  { %886 = dma.done.wait [#allocation6], 512  }
  0x36   :  { %887 = vsyncadd [#allocation6], 4294966784  ;;  %v895_v0 = vmov 0.0   ;;  %vm896_vm0 = vmmov 0   ;;  %v776_v1 = vld [vmem:[#allocation5] sm:$0xff]   ;;  %v777_v2 = vld [vmem:[#allocation5 + $0x8] sm:$0xff]  }
  0x37   :  { %691 = vmatprep.subr.bf16.mxu0 %v895_v0  ;;  %695 = vmatprep.mubr.msk.bf16.mxu0 %vm896_vm0, %v895_v0  ;;  %v55_v3 = vld [vmem:[#allocation2] sm:$0xf]  ;;  %vm72_vm1 = vcmask 261120   ;;  %s897_s2 = smov 96   ;;  %s898_s21 = smov 120   ;;  %vm122_vm2 = vcmask 64512  }
  0x38   :  { %699 = vmatprep.subr.bf16.mxu1 %v895_v0  ;;  %701 = vmatprep.mubr.msk.bf16.mxu1 %vm896_vm0, %v895_v0  ;;  %s899_s23 = smov 88   ;;  %s900_s24 = smov 80   ;;  %vm186_vm3 = vcmask 1043456   ;;  %vm574_vm4 = vcmask 130048   ;;  %vm576_vm5 = vcmask 195584  }
  0x39   :  { %692 = vmatpush3.bf16.msra.mxu0 %v776_v1  ;;  %s901_s25 = smov 112   ;;  %s902_s26 = smov 72  }
  0x3a   :  { %693 = vmatprep.subr.bf16.mxu0 %v895_v0  ;;  %s903_s27 = smov 104   ;;  %s904_s28 = smov 56  }
  0x3b   :  { %s905_s29 = smov 40   ;;  %s906_s30 = smov 48  }
  0x3c   :  { %s908_s4 = smov 16   ;;  %s909_s5 = smov 24  }
  0x3d   :  { %694 = vmatpush3.bf16.msra.mxu0 %v777_v2  ;;  %s910_s6 = smov [#allocation8]  }
  0x3e   :  { %705 = vmatprep.subr.bf16.mxu0 %v895_v0  ;;  %s645_s7 = sshll.u32 %s910_s6, 4  ;;  %s646_s7 = int_to_ptr.vmem [resolvable:$true] %s645_s7 }
  0x3f   :  { %s862_s8 = scalar_lea.vmem %s646_s7, 128  ;;  %p867_p11 = scmp.lt.s32.totalorder %s646_s7, %s646_s7 }
  0x40   :  { %696 = vmatmul.mubr.msk.bf16.vlgmr.msra.gmra.mrb[0].mxu0 %vm72_vm1, %v55_v3  ;;  %p863_p10 = scmp.ne.s32.totalorder %s646_s7, %s862_s8  ;;  %p868_p12 = scmp.lt.s32.totalorder %s862_s8, %s862_s8 }
  0x41   :  { %707 = vmatprep.mubr.msk.bf16.mxu0 %vm896_vm0, %v895_v0 }
  0x42   :  { %p869_p13 = por %p868_p12, %p867_p11 }
  0x44   :  { %p870_p0 = pnand %p869_p13, %p863_p10 }
 0x113   :  { %v110_v4 = vpop.f32.mrb[0].mxu0 }
 0x114   :  { %v116_v5 = vmul.f32 0.35355338, %v110_v4  ;;  %v984_v6 = vpack.c.bf16 %v110_v4, %v110_v4  ;;  %v697_v7 = vpop.f32.mrb[1].mxu0 }
 0x115   :  { %v113_v8 = vpop.f32.mrb[2].mxu0 }
 0x116   :  { %v117_v9 = vpack.c.bf16 %v116_v5, %v116_v5  ;;  %120 = vrot.lane.b32.xlu0 %v984_v6, %s897_s2  ;;  %v698_v10 = vpop.f32.mrb[3].mxu0 }
 0x118   :  { %231 = vrot.lane.b32.xlu1 %v117_v9, %s898_s21 }
 0x11a   :  { %233 = vrot.lane.b32.xlu0 %v984_v6, %s899_s23 }
 0x11c   :  { %343 = vrot.lane.b32.xlu1 %v984_v6, %s900_s24 }
 0x11e   :  { %341 = vrot.lane.b32.xlu0 %v117_v9, %s901_s25 }
 0x120   :  { %453 = vrot.lane.b32.xlu1 %v984_v6, %s902_s26 }
 0x122   :  { %451 = vrot.lane.b32.xlu0 %v117_v9, %s903_s27 }
 0x188   :  { %v121_v11 = vpop.permute.xlu0 %120 }
 0x189   :  { %v127_v12 = vsel %vm122_vm2, %v121_v11, 0 }
 0x18a   :  { %700 = vmatpush3.bf16.xpose.msra.mxu1 %v127_v12  ;;  %v232_v14 = vpop.permute.xlu1 %231 }
 0x18b   :  { %711 = vmatprep.subr.bf16.mxu1 %v895_v0 }
 0x18c   :  { %v234_v13 = vpop.permute.xlu0 %233 }
 0x18d   :  { %v239_v15 = vsel %vm122_vm2, %v234_v13, 0 }
 0x18e   :  { %v344_v16 = vpop.permute.xlu1 %343 }
 0x18f   :  { %v349_v17 = vsel %vm122_vm2, %v344_v16, 0 }
 0x190   :  { %v342_v19 = vpop.permute.xlu0 %341 }
 0x191   :  { %702 = vmatmul.mubr.msk.bf16.vlgmr.msra.gmra.mrb[0].mxu1 %vm122_vm2, %v117_v9 }
 0x192   :  { %712 = vmatpush3.bf16.xpose.msra.mxu1 %v239_v15  ;;  %713 = vmatprep.mubr.msk.bf16.mxu1 %vm896_vm0, %v895_v0  ;;  %v454_v18 = vpop.permute.xlu1 %453 }
 0x193   :  { %723 = vmatprep.subr.bf16.mxu1 %v895_v0  ;;  %v459_v20 = vsel %vm122_vm2, %v454_v18, 0 }
 0x194   :  { %v452_v21 = vpop.permute.xlu0 %451 }
 0x199   :  { %714 = vmatmul.mubr.msk.bf16.vlgmr.msra.gmra.mrb[4].mxu1 %vm122_vm2, %v232_v14 }
 0x19a   :  { %724 = vmatpush3.bf16.xpose.msra.mxu1 %v349_v17  ;;  %725 = vmatprep.mubr.msk.bf16.mxu1 %vm896_vm0, %v895_v0 }
 0x19b   :  { %735 = vmatprep.subr.bf16.mxu1 %v895_v0 }
 0x1a1   :  { %726 = vmatmul.mubr.msk.bf16.vlgmr.msra.gmra.mrb[8].mxu1 %vm122_vm2, %v342_v19 }
 0x1a2   :  { %736 = vmatpush3.bf16.xpose.msra.mxu1 %v459_v20  ;;  %737 = vmatprep.mubr.msk.bf16.mxu1 %vm896_vm0, %v895_v0 }
 0x1a3   :  { %747 = vmatprep.subr.bf16.mxu1 %v895_v0 }
 0x1a9   :  { %738 = vmatmul.mubr.msk.bf16.vlgmr.msra.gmra.mrb[12].mxu1 %vm122_vm2, %v452_v21 }
 0x1aa   :  { %751 = vmatprep.mubr.msk.bf16.mxu1 %vm896_vm0, %v895_v0 }
 0x264   :  { %v163_v22 = vpop.f32.mrb[0].mxu1 }
 0x265   :  { %v703_v23 = vpop.f32.mrb[1].mxu1  ;;  %v169_v24 = vsel %vm122_vm2, %v163_v22, -inf }
 0x266   :  { %170 = vmax.xlane.f32.xlu1 %v169_v24  ;;  %v166_v25 = vpop.f32.mrb[2].mxu1 }
 0x267   :  { %v704_v26 = vpop.f32.mrb[3].mxu1 }
 0x26c   :  { %v275_v27 = vpop.f32.mrb[4].mxu1 }
 0x26d   :  { %v715_v28 = vpop.f32.mrb[5].mxu1  ;;  %v281_v29 = vsel %vm122_vm2, %v275_v27, -inf }
 0x26e   :  { %282 = vmax.xlane.f32.xlu0 %v281_v29  ;;  %v278_v30 = vpop.f32.mrb[6].mxu1 }
 0x26f   :  { %v716_v31 = vpop.f32.mrb[7].mxu1 }
 0x270   :  { %v778_v31 = vld [vmem:[#allocation7] sm:$0xff]  }
 0x271   :  { %748 = vmatpush3.bf16.msra.mxu1 %v778_v31 }
 0x272   :  { %749 = vmatprep.subr.bf16.mxu1 %v895_v0 }
 0x274   :  { %v385_v32 = vpop.f32.mrb[8].mxu1 }
 0x275   :  { %v727_v33 = vpop.f32.mrb[9].mxu1  ;;  %v391_v34 = vsel %vm122_vm2, %v385_v32, -inf }
 0x276   :  { %392 = vmax.xlane.f32.xlu0 %v391_v34  ;;  %v388_v35 = vpop.f32.mrb[10].mxu1 }
 0x277   :  { %v728_v36 = vpop.f32.mrb[11].mxu1 }
 0x27c   :  { %v495_v37 = vpop.f32.mrb[12].mxu1 }
 0x27d   :  { %v739_v38 = vpop.f32.mrb[13].mxu1  ;;  %v501_v39 = vsel %vm122_vm2, %v495_v37, -inf }
 0x27e   :  { %502 = vmax.xlane.f32.xlu1 %v501_v39  ;;  %v498_v40 = vpop.f32.mrb[14].mxu1 }
 0x27f   :  { %v740_v41 = vpop.f32.mrb[15].mxu1 }
 0x2f3   :  { %v171_v42 = vpop.xlane.xlu1 %170 }
 0x2f4   :  { %v172_v43 = vsub.f32 %v163_v22, %v171_v42 }
 0x2f6   :  { %v173_v44 = vmul.f32 1.442695, %v172_v43 }
 0x2f8   :  { %780 = vpow2.f32 %v173_v44 }
 0x2fb   :  { %v283_v45 = vpop.xlane.xlu0 %282 }
 0x2fc   :  { %v284_v46 = vsub.f32 %v275_v27, %v283_v45 }
 0x2fe   :  { %v285_v47 = vmul.f32 1.442695, %v284_v46 }
 0x300   :  { %782 = vpow2.f32 %v285_v47 }
 0x302   :  { %v781_v48 = vpop.eup %780 }
 0x303   :  { %v393_v49 = vpop.xlane.xlu0 %392  ;;  %v175_v50 = vsel %vm122_vm2, %v781_v48, 0.0 }
 0x304   :  { %v394_v51 = vsub.f32 %v385_v32, %v393_v49  ;;  %176 = vadd.xlane.f32.xlu0 %v175_v50  ;;  %v779_v32 = vld [vmem:[#allocation7 + $0x8] sm:$0xff]  }
 0x305   :  { %750 = vmatpush3.bf16.msra.mxu1 %v779_v32 }
 0x306   :  { %v395_v52 = vmul.f32 1.442695, %v394_v51 }
 0x308   :  { %784 = vpow2.f32 %v395_v52 }
 0x30a   :  { %v783_v53 = vpop.eup %782 }
 0x30b   :  { %v287_v54 = vsel %vm122_vm2, %v783_v53, 0.0  ;;  %v503_v57 = vpop.xlane.xlu1 %502 }
 0x30c   :  { %288 = vadd.xlane.f32.xlu1 %v287_v54  ;;  %v504_v58 = vsub.f32 %v495_v37, %v503_v57 }
 0x30e   :  { %v505_v59 = vmul.f32 1.442695, %v504_v58 }
 0x310   :  { %786 = vpow2.f32 %v505_v59 }
 0x312   :  { %v785_v55 = vpop.eup %784 }
 0x313   :  { %v397_v56 = vsel %vm122_vm2, %v785_v55, 0.0 }
 0x314   :  { %398 = vadd.xlane.f32.xlu0 %v397_v56 }
 0x31a   :  { %v787_v60 = vpop.eup %786 }
 0x31b   :  { %v507_v61 = vsel %vm122_vm2, %v787_v60, 0.0 }
 0x31d   :  { %293 = vrot.lane.b32.xlu1 %v984_v6, %s904_s28 }
 0x32a   :  { %181 = vrot.lane.b32.xlu0 %v984_v6, %s891_s22  ;;  %s907_s22 = smov 8  }
 0x32e   :  { %513 = vrot.lane.b32.xlu0 %v984_v6, %s905_s29 }
 0x341   :  { %508 = vadd.xlane.f32.xlu1 %v507_v61 }
 0x352   :  { %403 = vrot.lane.b32.xlu1 %v984_v6, %s906_s30 }
 0x391   :  { %v177_v62 = vpop.xlane.xlu0 %176 }
 0x392   :  { %788 = vrcp.f32 %v177_v62 }
 0x399   :  { %v289_v63 = vpop.xlane.xlu1 %288 }
 0x39a   :  { %790 = vrcp.f32 %v289_v63 }
 0x39c   :  { %v789_v1 = vpop.eup %788 }
 0x39d   :  { %v179_v3 = vmul.f32 %v789_v1, %v781_v48  ;;  %v294_v7 = vpop.permute.xlu1 %293 }
 0x39e   :  { %v299_v10 = vsel %vm186_vm3, %v294_v7, 0 }
 0x39f   :  { %v180_v8 = vpack.c.bf16 %v179_v3, %v179_v3 }
 0x3a1   :  { %v399_v2 = vpop.xlane.xlu0 %398 }
 0x3a2   :  { %792 = vrcp.f32 %v399_v2 }
 0x3a4   :  { %v791_v9 = vpop.eup %790 }
 0x3a5   :  { %v182_v4 = vpop.permute.xlu0 %181  ;;  %v291_v6 = vmul.f32 %v791_v9, %v783_v53 }
 0x3a6   :  { %v188_v5 = vsel %vm186_vm3, %v182_v4, 0 }
 0x3a7   :  { %706 = vmatpush3.bf16.msra.mxu0 %v188_v5  ;;  %v292_v11 = vpack.c.bf16 %v291_v6, %v291_v6 }
 0x3a8   :  { %717 = vmatprep.subr.bf16.mxu0 %v895_v0 }
 0x3a9   :  { %v514_v17 = vpop.permute.xlu0 %513 }
 0x3aa   :  { %708 = vmatmul.mubr.msk.bf16.vlgmr.msra.gmra.mrb[4].mxu0 %vm122_vm2, %v180_v8  ;;  %v519_v19 = vsel %vm186_vm3, %v514_v17, 0 }
 0x3ab   :  { %718 = vmatpush3.bf16.msra.mxu0 %v299_v10  ;;  %719 = vmatprep.mubr.msk.bf16.mxu0 %vm896_vm0, %v895_v0 }
 0x3ac   :  { %729 = vmatprep.subr.bf16.mxu0 %v895_v0  ;;  %v793_v12 = vpop.eup %792 }
 0x3ad   :  { %v401_v14 = vmul.f32 %v793_v12, %v785_v55 }
 0x3af   :  { %v402_v18 = vpack.c.bf16 %v401_v14, %v401_v14 }
 0x3b2   :  { %720 = vmatmul.mubr.msk.bf16.vlgmr.msra.gmra.mrb[8].mxu0 %vm122_vm2, %v292_v11 }
 0x3b3   :  { %731 = vmatprep.mubr.msk.bf16.mxu0 %vm896_vm0, %v895_v0 }
 0x3ce   :  { %v509_v13 = vpop.xlane.xlu1 %508 }
 0x3cf   :  { %794 = vrcp.f32 %v509_v13 }
 0x3d2   :  { %v404_v15 = vpop.permute.xlu1 %403 }
 0x3d3   :  { %v409_v16 = vsel %vm186_vm3, %v404_v15, 0 }
 0x3d4   :  { %730 = vmatpush3.bf16.msra.mxu0 %v409_v16 }
 0x3d5   :  { %741 = vmatprep.subr.bf16.mxu0 %v895_v0 }
 0x3d7   :  { %732 = vmatmul.mubr.msk.bf16.vlgmr.msra.gmra.mrb[12].mxu0 %vm122_vm2, %v402_v18 }
 0x3d8   :  { %742 = vmatpush3.bf16.msra.mxu0 %v519_v19  ;;  %743 = vmatprep.mubr.msk.bf16.mxu0 %vm896_vm0, %v895_v0 }
 0x3d9   :  { %v795_v20 = vpop.eup %794 }
 0x3da   :  { %v511_v21 = vmul.f32 %v795_v20, %v787_v60 }
 0x3dc   :  { %v512_v22 = vpack.c.bf16 %v511_v21, %v511_v21 }
 0x3df   :  { %744 = vmatmul.mubr.msk.bf16.vlgmr.msra.gmra.mrb[16].mxu0 %vm122_vm2, %v512_v22 }
 0x47d   :  { %v224_v23 = vpop.f32.mrb[4].mxu0 }
 0x47e   :  { %v709_v24 = vpop.f32.mrb[5].mxu0 }
 0x47f   :  { %v227_v25 = vpop.f32.mrb[6].mxu0 }
 0x480   :  { %v710_v26 = vpop.f32.mrb[7].mxu0 }
 0x485   :  { %v335_v27 = vpop.f32.mrb[8].mxu0 }
 0x486   :  { %562 = vrot.lane.b32.xlu1 %v335_v27, %s907_s22  ;;  %v721_v28 = vpop.f32.mrb[9].mxu0 }
 0x487   :  { %v338_v29 = vpop.f32.mrb[10].mxu0 }
 0x488   :  { %v722_v30 = vpop.f32.mrb[11].mxu0 }
 0x4aa   :  { %v445_v33 = vpop.f32.mrb[12].mxu0 }
 0x4ab   :  { %566 = vrot.lane.b32.xlu0 %v445_v33, %s908_s4  ;;  %v733_v34 = vpop.f32.mrb[13].mxu0 }
 0x4ac   :  { %v448_v35 = vpop.f32.mrb[14].mxu0 }
 0x4ad   :  { %v734_v36 = vpop.f32.mrb[15].mxu0 }
 0x4b2   :  { %v555_v37 = vpop.f32.mrb[16].mxu0 }
 0x4b3   :  { %570 = vrot.lane.b32.xlu1 %v555_v37, %s909_s5  ;;  %v745_v38 = vpop.f32.mrb[17].mxu0 }
 0x4b4   :  { %v558_v39 = vpop.f32.mrb[18].mxu0 }
 0x4b5   :  { %v746_v40 = vpop.f32.mrb[19].mxu0 }
 0x4f8   :  { %v563_v41 = vpop.permute.xlu1 %562 }
 0x4f9   :  { %v573_v0 = vsel %vm122_vm2, %v224_v23, %v563_v41 }
 0x51d   :  { %v567_v42 = vpop.permute.xlu0 %566 }
 0x51e   :  { %v575_v43 = vsel %vm574_vm4, %v573_v0, %v567_v42 }
 0x525   :  { %v571_v44 = vpop.permute.xlu1 %570 }
 0x526   :  { %v577_v45 = vsel %vm576_vm5, %v575_v43, %v571_v44 }
 0x527   :  { %v578_v46 = vpack.c.bf16 %v577_v45, %v577_v45 }
 0x529   :  { %752 = vmatmul.mubr.msk.bf16.vlgmr.msra.gmra.mrb[16].mxu1 %vm72_vm1, %v578_v46 }
 0x5fc   :  { %v632_v47 = vpop.f32.mrb[16].mxu1 }
 0x5fd   :  { %638 = vst.msk [vmem:[#allocation8] sm:$0xff] %vm72_vm1, %v632_v47  ;;  %v753_v48 = vpop.f32.mrb[17].mxu1 }
 0x5fe   :  { %v635_v49 = vpop.f32.mrb[18].mxu1 }
 0x5ff   :  { %873 = shalt.err (!%p870_p0)
}
 0x600   :  { %s874_s10 = scalar_lea.hbm %s1059_s3, 128 }
 0x601   :  { %p875_p1 = scmp.ne.s32.totalorder %s1059_s3, %s874_s10  ;;  %p878_p2 = scmp.lt.u32.totalorder %s874_s10, %s1059_s3 }
 0x603   :  { %p880_p3 = pnand %p878_p2, %p875_p1 }
 0x605   :  { %883 = shalt.err (!%p880_p3)
}
 0x606   :  { %648 = dma.vmem_to_hbm [thread:$0]  %s646_s7, 128, %s1059_s3, [#allocation4]   ;;  %v754_v50 = vpop.f32.mrb[19].mxu1 }
 0x607   :  { %888 = dma.done.wait [#allocation4], 128  }
 0x608   :  { %889 = vsyncadd [#allocation4], 4294967168 }
 0x609   :  { %652 = vsyncpa [#allocation3], 1 }
 0x60a   :  { %653 = vsyncpa [#allocation6], 1 }
 0x60b   :  { %654 = vsyncpa [#allocation4], 1 }

</bundles_post_ra>
